<compile_context>
chip_gen: v6e
topology: v6e:2x2x1
jax: 0.10.0
libtpu: 0.0.40
codegen_flags: <defaults>
</compile_context>

<pallas_src>
import jax
import jax.numpy as jnp
from jax.experimental import pallas as pl
from jax.experimental.pallas import tpu as pltpu


def _cdiv(a, b):
    return -(-a // b)


def _round_up(x, m):
    return _cdiv(x, m) * m


def _chip_config():
    """Per-generation tiling / VMEM budget, keyed off VMEM capacity."""
    try:
        vmem_cap = int(pltpu.get_tpu_info().vmem_capacity_bytes)
    except Exception:
        vmem_cap = 64 * 1024 * 1024  # conservative (v7x-sized) fallback
    if vmem_cap >= 96 * 1024 * 1024:
        # v5e / v6e: 128 MiB VMEM, single TensorCore.
        return {"vmem_limit": 96 * 1024 * 1024, "row_cap": 512,
                "spatial_cap": 4096, "two_tc": False}
    # v7x (64 MiB VMEM, 2 TCs) or unknown: keep the budget ~2x tighter.
    return {"vmem_limit": 48 * 1024 * 1024, "row_cap": 512,
            "spatial_cap": 2048, "two_tc": True}


# ---------------------------------------------------------------------------
# Fused single-pass path: one batch slab (C, S) resident in VMEM per grid step.
# ---------------------------------------------------------------------------
def _make_fused_kernel(inv_s):
    def kernel(x_ref, w1_ref, b1_ref, w2_ref, b2_ref, o_ref):
        x = x_ref[...]                                            # (C, S)
        mean = jnp.sum(x, axis=-1, keepdims=True,
                       dtype=jnp.float32) * inv_s                 # (C, 1)
        h = jnp.dot(w1_ref[...], mean,
                    preferred_element_type=jnp.float32) + b1_ref[...]
        h = jnp.maximum(h, 0.0)                                   # (C_red, 1)
        z = jnp.dot(w2_ref[...], h,
                    preferred_element_type=jnp.float32) + b2_ref[...]
        g = 1.0 / (1.0 + jnp.exp(-z))                             # (C, 1)
        o_ref[...] = x * g.astype(x.dtype)
    return kernel


# ---------------------------------------------------------------------------
# Pass 1 (fallback path): row sums over the spatial axis.
#   Hot loop = lane-chunk VPU adds into a (tR, 128) f32 scratch; the cross-lane
#   reduce + narrow store only run on the last spatial step.  Ragged spatial
#   tail masked in-kernel (no HBM-side padding of x).
# ---------------------------------------------------------------------------
def _make_squeeze_kernel(S, tS):
    n_chunks = tS // 128
    ragged = (S % tS) != 0

    def kernel(x_ref, sum_ref, acc_ref):
        j = pl.program_id(1)

        @pl.when(j == 0)
        def _():
            acc_ref[...] = jnp.zeros_like(acc_ref)

        x = x_ref[...]
        if ragged:
            lane = jax.lax.broadcasted_iota(jnp.int32, x.shape, 1)
            x = jnp.where(j * tS + lane < S, x, jnp.zeros_like(x))

        acc = acc_ref[...]
        for q in range(n_chunks):                      # static, lane-aligned
            acc = acc + x[:, q * 128:(q + 1) * 128].astype(jnp.float32)
        acc_ref[...] = acc

        @pl.when(j == pl.num_programs(1) - 1)
        def _():
            sum_ref[...] = jnp.sum(acc_ref[...], axis=-1, keepdims=True)

    return kernel


# ---------------------------------------------------------------------------
# Pass 3 (fallback path): x * gate, gate broadcast along the lane axis.
# ---------------------------------------------------------------------------
def _scale_kernel(x_ref, g_ref, o_ref):
    o_ref[...] = x_ref[...] * g_ref[...]


def channel_se_layer_3d(x, w1, b1, w2, b2, *, donate_x=False,
                        force_multipass=False):
    """
    x : (B, C, D, H, W)
    w1: (C_red, C)  fc1 weight (PyTorch layout), b1: (C_red,)
    w2: (C, C_red)  fc2 weight (PyTorch layout), b2: (C,)
    donate_x: alias the output onto x's buffer (only if the caller donates x).
    """
    B, C, D, H, W = x.shape
    S = D * H * W
    R = B * C
    C_red = w1.shape[0]

    cfg = _chip_config()
    itemsize = jnp.dtype(x.dtype).itemsize
    sub = max(8, 32 // itemsize)          # dtype-aware sublane alignment

    w1 = w1.astype(jnp.float32)
    b1 = b1.astype(jnp.float32)
    w2 = w2.astype(jnp.float32)
    b2 = b2.astype(jnp.float32)

    # ---------------- fused single-pass path (2|x| HBM traffic) ----------------
    slab_bytes = C * S * itemsize
    fused_fits = 4 * slab_bytes + (2 << 20) <= cfg["vmem_limit"]

    if fused_fits and not force_multipass:
        x3 = x.reshape(B, C, S)           # free view
        out = pl.pallas_call(
            _make_fused_kernel(1.0 / float(S)),
            out_shape=jax.ShapeDtypeStruct((B, C, S), x.dtype),
            grid_spec=pltpu.PrefetchScalarGridSpec(
                num_scalar_prefetch=0,
                grid=(B,),
                in_specs=[
                    pl.BlockSpec((None, C, S), lambda b: (b, 0, 0)),
                    pl.BlockSpec((C_red, C), lambda b: (0, 0)),
                    pl.BlockSpec((C_red, 1), lambda b: (0, 0)),
                    pl.BlockSpec((C, C_red), lambda b: (0, 0)),
                    pl.BlockSpec((C, 1), lambda b: (0, 0)),
                ],
                out_specs=pl.BlockSpec((None, C, S), lambda b: (b, 0, 0)),
            ),
            compiler_params=pltpu.CompilerParams(
                dimension_semantics=("parallel",),
                vmem_limit_bytes=cfg["vmem_limit"],
            ),
            input_output_aliases=({0: 0} if donate_x else {}),
        )(x3, w1, b1.reshape(C_red, 1), w2, b2.reshape(C, 1))
        return out.reshape(B, C, D, H, W)

    # ---------------- fallback: squeeze + (jnp gate MLP) + scale ----------------
    # Spatial (lane) tiles: multiples of 128, capped per generation.
    n_s = max(1, _cdiv(S, cfg["spatial_cap"]))
    tS = _round_up(_cdiv(S, n_s), 128)
    grid_s = _cdiv(S, tS)

    # Row (sublane) tiles: dtype-aligned; on 2-TC chips force >= 2 row tiles so
    # the squeeze pass (whose only "parallel" axis is rows) uses both cores.
    min_r_tiles = 2 if (cfg["two_tc"] and R >= 2 * sub) else 1
    n_r = max(_cdiv(R, cfg["row_cap"]), min_r_tiles)
    tR = _round_up(_cdiv(R, n_r), sub)
    grid_r = _cdiv(R, tR)

    x_rows = x.reshape(R, S)              # free view, no padding copy

    # Pass 1: per-row (batch, channel) sums, f32 accumulation in VMEM scratch.
    sums = pl.pallas_call(
        _make_squeeze_kernel(S, tS),
        out_shape=jax.ShapeDtypeStruct((R, 1), jnp.float32),
        grid_spec=pltpu.PrefetchScalarGridSpec(
            num_scalar_prefetch=0,
            grid=(grid_r, grid_s),
            in_specs=[pl.BlockSpec((tR, tS), lambda i, j: (i, j))],
            out_specs=pl.BlockSpec((tR, 1), lambda i, j: (i, 0)),
            scratch_shapes=[pltpu.VMEM((tR, 128), jnp.float32)],
        ),
        compiler_params=pltpu.CompilerParams(
            dimension_semantics=("parallel", "arbitrary"),
            vmem_limit_bytes=cfg["vmem_limit"],
        ),
    )(x_rows)

    # Gate MLP in plain jnp: (B,C)@(C,C_red) is far below one MXU tile, so a
    # dedicated pallas_call is pure launch overhead.
    means = sums.reshape(B, C) * (1.0 / float(S))
    h = jnp.maximum(means @ w1.T + b1, 0.0)
    gates = jax.nn.sigmoid(h @ w2.T + b2)                    # (B, C) f32
    g_rows = gates.astype(x.dtype).reshape(R, 1)             # pre-cast to x dtype

    # Pass 3: gated elementwise multiply; ragged edge blocks rely on Pallas
    # dropping out-of-bounds writes (garbage reads never land in HBM).
    out_rows = pl.pallas_call(
        _scale_kernel,
        out_shape=jax.ShapeDtypeStruct((R, S), x.dtype),
        grid_spec=pltpu.PrefetchScalarGridSpec(
            num_scalar_prefetch=0,
            grid=(grid_r, grid_s),
            in_specs=[
                pl.BlockSpec((tR, tS), lambda i, j: (i, j)),
                pl.BlockSpec((tR, 1), lambda i, j: (i, 0)),
            ],
            out_specs=pl.BlockSpec((tR, tS), lambda i, j: (i, j)),
        ),
        compiler_params=pltpu.CompilerParams(
            dimension_semantics=("parallel", "parallel"),
            vmem_limit_bytes=cfg["vmem_limit"],
        ),
        input_output_aliases=({0: 0} if donate_x else {}),
    )(x_rows, g_rows)

    return out_rows.reshape(B, C, D, H, W)


def _reference(x, w1, b1, w2, b2):
    # Pure-JAX reference mirroring the PyTorch forward (PyTorch weight layout).
    B, C = x.shape[0], x.shape[1]
    s = jnp.mean(x.reshape(B, C, -1), axis=-1)               # (B, C)
    h = jnp.maximum(s @ w1.T + b1, 0.0)                      # (B, C_red)
    g = jax.nn.sigmoid(h @ w2.T + b2)                        # (B, C)
    return x * g[:, :, None, None, None]


if __name__ == "__main__":
    # Small shapes consistent with the module: B=2, C=4, D=H=W=8,
    # reduction_ratio=2 -> C_red=2.
    B, C, D, H, W = 2, 4, 8, 8, 8
    reduction_ratio = 2
    C_red = C // reduction_ratio

    key = jax.random.PRNGKey(0)
    kx, k1, k2, k3, k4 = jax.random.split(key, 5)

    x = jax.random.normal(kx, (B, C, D, H, W), dtype=jnp.float32)

    # Deterministic synthetic parameters (PyTorch-Linear-like uniform init),
    # in native PyTorch layout: w1 (C_red, C), w2 (C, C_red).
    bound1 = 1.0 / (C ** 0.5)
    w1 = jax.random.uniform(k1, (C_red, C), jnp.float32, -bound1, bound1)
    b1 = jax.random.uniform(k2, (C_red,), jnp.float32, -bound1, bound1)
    bound2 = 1.0 / (C_red ** 0.5)
    w2 = jax.random.uniform(k3, (C, C_red), jnp.float32, -bound2, bound2)
    b2 = jax.random.uniform(k4, (C,), jnp.float32, -bound2, bound2)

    ref = _reference(x, w1, b1, w2, b2)

    # Fused single-pass path (default dispatch for these small slabs).
    out_fused = jax.block_until_ready(channel_se_layer_3d(x, w1, b1, w2, b2))
    assert out_fused.shape == (B, C, D, H, W)
    assert jnp.allclose(out_fused, ref, atol=1e-5, rtol=1e-5), "fused mismatch"

    # Multi-pass fallback path (exercised explicitly for coverage).
    out_mp = jax.block_until_ready(
        channel_se_layer_3d(x, w1, b1, w2, b2, force_multipass=True))
    assert jnp.allclose(out_mp, ref, atol=1e-5, rtol=1e-5), "multipass mismatch"

    print("KERNEL_OK")
</pallas_src>

<mosaic_0001>
module attributes {stable_mosaic.version = 11 : i64} {
  func.func @kernel(%arg0: i32, %arg1: memref<1x4x512xf32, #tpu.memory_space<vmem>>, %arg2: memref<2x4xf32, #tpu.memory_space<vmem>>, %arg3: memref<2x1xf32, #tpu.memory_space<vmem>>, %arg4: memref<4x2xf32, #tpu.memory_space<vmem>>, %arg5: memref<4x1xf32, #tpu.memory_space<vmem>>, %arg6: memref<1x4x512xf32, #tpu.memory_space<vmem>>) attributes {dimension_semantics = [#tpu.dimension_semantics<parallel>], iteration_bounds = array<i64: 2>, scalar_prefetch = 0 : i64, scratch_operands = 0 : i64, tpu.core_type = #tpu.core_type<tc>, window_params = [{transform_indices = @transform_0, window_bounds = array<i64: 1, 4, 512>}, {pipeline_mode = #tpu.pipeline_mode<synchronous>, transform_indices = @transform_1, window_bounds = array<i64: 2, 4>}, {pipeline_mode = #tpu.pipeline_mode<synchronous>, transform_indices = @transform_2, window_bounds = array<i64: 2, 1>}, {pipeline_mode = #tpu.pipeline_mode<synchronous>, transform_indices = @transform_3, window_bounds = array<i64: 4, 2>}, {pipeline_mode = #tpu.pipeline_mode<synchronous>, transform_indices = @transform_4, window_bounds = array<i64: 4, 1>}, {transform_indices = @transform_5, window_bounds = array<i64: 1, 4, 512>}]} {
    %c0 = arith.constant 0 : index
    %c0_0 = arith.constant 0 : index
    %c0_1 = arith.constant 0 : index
    %0 = vector.load %arg1[%c0, %c0_0, %c0_1] : memref<1x4x512xf32, #tpu.memory_space<vmem>>, vector<1x4x512xf32>
    %1 = vector.shape_cast %0 : vector<1x4x512xf32> to vector<4x512xf32>
    %cst = arith.constant dense<0.000000e+00> : vector<4xf32>
    %2 = vector.multi_reduction <add>, %1, %cst [1] : vector<4x512xf32> to vector<4xf32>
    %3 = vector.shape_cast %2 : vector<4xf32> to vector<4x1xf32>
    %cst_2 = arith.constant 0.001953125 : f32
    %4 = vector.broadcast %cst_2 : f32 to vector<4x1xf32>
    %5 = arith.mulf %3, %4 : vector<4x1xf32>
    %c0_3 = arith.constant 0 : index
    %c0_4 = arith.constant 0 : index
    %6 = vector.load %arg2[%c0_3, %c0_4] : memref<2x4xf32, #tpu.memory_space<vmem>>, vector<2x4xf32>
    %cst_5 = arith.constant dense<0.000000e+00> : vector<2x1xf32>
    %7 = tpu.matmul %6, %5, %cst_5 {dimension_numbers = #tpu.dot_dimension_numbers<[1], [0], [0], [1], [0, 0, 1, 1], [], []>} : vector<2x4xf32>, vector<4x1xf32>, vector<2x1xf32> -> vector<2x1xf32>
    %c0_6 = arith.constant 0 : index
    %c0_7 = arith.constant 0 : index
    %8 = vector.load %arg3[%c0_6, %c0_7] : memref<2x1xf32, #tpu.memory_space<vmem>>, vector<2x1xf32>
    %9 = arith.addf %7, %8 : vector<2x1xf32>
    %cst_8 = arith.constant 0.000000e+00 : f32
    %10 = vector.broadcast %cst_8 : f32 to vector<2x1xf32>
    %11 = arith.maximumf %9, %10 : vector<2x1xf32>
    %c0_9 = arith.constant 0 : index
    %c0_10 = arith.constant 0 : index
    %12 = vector.load %arg4[%c0_9, %c0_10] : memref<4x2xf32, #tpu.memory_space<vmem>>, vector<4x2xf32>
    %cst_11 = arith.constant dense<0.000000e+00> : vector<4x1xf32>
    %13 = tpu.matmul %12, %11, %cst_11 {dimension_numbers = #tpu.dot_dimension_numbers<[1], [0], [0], [1], [0, 0, 1, 1], [], []>} : vector<4x2xf32>, vector<2x1xf32>, vector<4x1xf32> -> vector<4x1xf32>
    %c0_12 = arith.constant 0 : index
    %c0_13 = arith.constant 0 : index
    %14 = vector.load %arg5[%c0_12, %c0_13] : memref<4x1xf32, #tpu.memory_space<vmem>>, vector<4x1xf32>
    %15 = arith.addf %13, %14 : vector<4x1xf32>
    %cst_14 = arith.constant 0.000000e+00 : f32
    %16 = vector.broadcast %cst_14 : f32 to vector<4x1xf32>
    %17 = arith.subf %16, %15 : vector<4x1xf32>
    %18 = math.exp %17 : vector<4x1xf32>
    %cst_15 = arith.constant 1.000000e+00 : f32
    %19 = vector.broadcast %cst_15 : f32 to vector<4x1xf32>
    %20 = arith.addf %19, %18 : vector<4x1xf32>
    %cst_16 = arith.constant 1.000000e+00 : f32
    %21 = vector.broadcast %cst_16 : f32 to vector<4x1xf32>
    %22 = arith.divf %21, %20 : vector<4x1xf32>
    %23 = vector.broadcast %22 : vector<4x1xf32> to vector<4x512xf32>
    %24 = arith.mulf %1, %23 : vector<4x512xf32>
    %c0_17 = arith.constant 0 : index
    %c0_18 = arith.constant 0 : index
    %c0_19 = arith.constant 0 : index
    %25 = vector.load %arg6[%c0_17, %c0_18, %c0_19] : memref<1x4x512xf32, #tpu.memory_space<vmem>>, vector<1x4x512xf32>
    %26 = vector.shape_cast %25 : vector<1x4x512xf32> to vector<4x512xf32>
    %27 = vector.shape_cast %24 : vector<4x512xf32> to vector<1x4x512xf32>
    tpu.vector_store %arg6[%c0_17, %c0_18, %c0_19], %27 {strides = array<i32>} : memref<1x4x512xf32, #tpu.memory_space<vmem>>, vector<1x4x512xf32>,
    return
  }
  func.func @transform_0(%arg0: i32) -> (i32, i32, i32) {
    %c0_i32 = arith.constant 0 : i32
    %c0_i32_0 = arith.constant 0 : i32
    %c0_i32_1 = arith.constant 0 : i32
    return %arg0, %c0_i32, %c0_i32_0 : i32, i32, i32
  }
  func.func @transform_1(%arg0: i32) -> (i32, i32) {
    %c0_i32 = arith.constant 0 : i32
    %c0_i32_0 = arith.constant 0 : i32
    %c0_i32_1 = arith.constant 0 : i32
    return %c0_i32, %c0_i32_0 : i32, i32
  }
  func.func @transform_2(%arg0: i32) -> (i32, i32) {
    %c0_i32 = arith.constant 0 : i32
    %c0_i32_0 = arith.constant 0 : i32
    %c0_i32_1 = arith.constant 0 : i32
    return %c0_i32, %c0_i32_0 : i32, i32
  }
  func.func @transform_3(%arg0: i32) -> (i32, i32) {
    %c0_i32 = arith.constant 0 : i32
    %c0_i32_0 = arith.constant 0 : i32
    %c0_i32_1 = arith.constant 0 : i32
    return %c0_i32, %c0_i32_0 : i32, i32
  }
  func.func @transform_4(%arg0: i32) -> (i32, i32) {
    %c0_i32 = arith.constant 0 : i32
    %c0_i32_0 = arith.constant 0 : i32
    %c0_i32_1 = arith.constant 0 : i32
    return %c0_i32, %c0_i32_0 : i32, i32
  }
  func.func @transform_5(%arg0: i32) -> (i32, i32, i32) {
    %c0_i32 = arith.constant 0 : i32
    %c0_i32_0 = arith.constant 0 : i32
    %c0_i32_1 = arith.constant 0 : i32
    return %arg0, %c0_i32, %c0_i32_0 : i32, i32, i32
  }
}

</mosaic_0001>

<bundles_post_ra>
// kernel: tpu_custom_call.1
= control target key start
LH: loop header
LB: loop body
LE: loop exit
PB: predicated region body
PF: predicated region fallthrough
CT: control target
= control target key end

     0   :  { %10 = vsyncpa [#allocation3], 0  ;;  %s916_s0 = inlined_call_operand.hbm [shape: f32[2,4,512], index: 0, kind: input, shape index: {}]   ;;  %s917_s1 = inlined_call_operand.vmem [shape: f32[2,4], index: 1, kind: input, shape index: {}]   ;;  %s918_s2 = inlined_call_operand.vmem [shape: f32[2,1], index: 2, kind: input, shape index: {}]   ;;  %s919_s3 = inlined_call_operand.vmem [shape: f32[4,2], index: 3, kind: input, shape index: {}]   ;;  %s920_s4 = inlined_call_operand.vmem [shape: f32[4,1], index: 4, kind: input, shape index: {}]   ;;  %s921_s5 = inlined_call_operand.hbm [shape: f32[2,4,512], index: 5, kind: output, shape index: {}]  }
   0x1   :  { %12 = vsyncpa [#allocation3 + $0x1], 0 }
   0x2   :  { %13 = vsyncpa [#allocation4], 0 }
   0x3   :  { %15 = vsyncpa [#allocation4 + $0x1], 0  ;;  %s748_s18 = smov 0   ;;  %s750_s19 = smov 0  }
   0x4   :  { %s752_s20 = smov 0   ;;  %s754_s21 = smov 0  }
   0x5 LB: > { %s769_s22 = sadd.s32 4294967295, %s710_s21   ;;  %s527_s23 = sadd.s32 4294967294, %s710_s21   ;;  %s710_s21 = sphi %s754_s21, %s938_s21   ;;  %s706_s20 = sphi %s752_s20, %s937_s20   ;;  %s702_s19 = sphi %s750_s19, %s936_s19   ;;  %s698_s18 = sphi %s748_s18, %s935_s18  }
   0x6   : > { %s773_s24 = sadd.s32 1, %s710_s21   ;;  %s28_s25 = sadd.s32 1, %s706_s20 }
   0x7   : > { %s25_s26 = ssub.s32 %s710_s21, %s773_s24  ;;  %p35_p0 = scmp.ne.s32.totalorder %s706_s20, %s702_s19 }
   0x8   : > { %p26_p1 = scmp.eq.s32.totalorder %s25_s26, 0  ;;  %p36_p2 = scmp.eq.s32.totalorder %s710_s21, 0 }
   0x9   : > { %p41_p3 = scmp.ne.s32.totalorder %s702_s19, %s698_s18  ;;  %p42_p4 = scmp.eq.s32.totalorder %s769_s22, 0 }
   0xa   : > { %s785_s27 = scalar_select %p26_p1, %s706_s20, %s28_s25  }
   0xb   : > { %p787_p5 = por %p36_p2, %p35_p0  ;;  %p791_p6 = por %p42_p4, %p41_p3 }
   0xc   : > { %p149_p7 = scmp.eq.s32.totalorder %s769_s22, 1  ;;  %p155_p8 = scmp.eq.s32.totalorder %s527_s23, 1 }
   0xd   : > { %s925_s29 = scalar_select %p791_p6, 1, 0 }
   0xe   : > { %p573_p10 = scmp.lt.s32.totalorder %s710_s21, 2  ;;  %p798_p11 = por %p149_p7, %p35_p0 }
   0xf   : > { %p802_p12 = por %p155_p8, %p41_p3  ;;  %s187_s7 = sand.u32 1, %s706_s20  }
  0x10   : > { %s926_s30 = scalar_select %p798_p11, 1, 0 }
  0x11   : > { %s927_s6 = scalar_select %p802_p12, 1, 0 }
  0x12   : > { %s545_s8 = sshll.u32 %s710_s21, 8  ;;  %s530_s9 = sshll.u32 %s187_s7, 4 }
  0x13   : > { %s811_s12 = scalar_lea.hbm %s916_s0, %s545_s8  ;;  %s191_s13 = scalar_lea.vmem [#allocation2], %s530_s9 }
  0x14   : > { %s199_s14 = sshll.u32 %s191_s13, 4  ;;  %p815_p13 = pnand %p573_p10, %p787_p5  ;;  %s819_s14 = int_to_ptr.vmem [resolvable:$true] %s199_s14 }
  0x15   : > { %s188_s16 = scalar_lea.sflag [#allocation3], %s187_s7  ;;  %s618_s17 = scalar_lea.hbm %s811_s12, 256 }
  0x16   : > { %p619_p2 = scmp.ne.s32.totalorder %s811_s12, %s618_s17  ;;  %p620_p3 = pneg %p815_p13 }
  0x17   : > { %s623_s26 = scalar_lea.hbm %s916_s0, 512  ;;  %p624_p5 = scmp.lt.s32.totalorder %s811_s12, %s916_s0 }
  0x18   : > { %p621_p4 = pnand %p620_p3, %p619_p2  ;;  %p625_p8 = scmp.lt.s32.totalorder %s623_s26, %s618_s17 }
  0x1a   : > { %p622_p7 = pneg %p621_p4  ;;  %p626_p10 = por %p625_p8, %p624_p5 }
  0x1c   : > { %p627_p9 = pnand %p626_p10, %p622_p7 }
  0x1e   : > { %630 = shalt.err (!%p627_p9)
}
  0x1f   : > { %s631_s7 = scalar_lea.vmem %s819_s14, 256  ;;  %s712_s9 = smov [#allocation2]  }
  0x20   : > { %p632_p0 = scmp.ne.s32.totalorder %s819_s14, %s631_s7  ;;  %s636_s10 = sshll.u32 %s712_s9, 4  ;;  %s637_s10 = int_to_ptr.vmem [resolvable:$false] %s636_s10 }
  0x21   : > { %s638_s11 = scalar_lea.vmem %s637_s10, 512  ;;  %p639_p4 = scmp.lt.s32.totalorder %s819_s14, %s637_s10 }
  0x22   : > { %p634_p1 = pnand %p632_p0, %p620_p3  ;;  %p640_p12 = scmp.lt.s32.totalorder %s638_s11, %s631_s7 }
  0x24   : > { %p635_p2 = pneg %p634_p1  ;;  %p641_p11 = por %p640_p12, %p639_p4 }
  0x26   : > { %p642_p6 = pnand %p641_p11, %p635_p2 }
  0x28   : > { %645 = shalt.err (!%p642_p6)
}
  0x29   : > { %568 = dma.hbm_to_vmem [thread:$0]  (!%p815_p13), %s811_s12, 256, %s819_s14, %s188_s16  }
  0x2a   : > { %p929_p9 = scmp.lt.s32.totalorder %s710_s21, 3  ;;  %p930_p7 = scmp.ge.s32.totalorder %s710_s21, 1 }
  0x2c   : > { %p205_p0 = pnand %p930_p7, %p929_p9 }
  0x2d   : > { %s846_s13 = sand.u32 (!%p205_p0), 1, %s702_s19   ;;  %p931_p6 = scmp.ne.s32.totalorder (!%p205_p0), %s925_s29, 0 }
  0x2e   : > { %208 = sbr.rel (%p205_p0) target bundleno = 771 (0x303), region = 40  ;;  %s534_s17 = sshll.u32 (!%p205_p0), %s846_s13, 4 }
  0x2f   : > { %s211_s23 = scalar_lea.sflag (!%p205_p0), [#allocation3], %s846_s13  ;;  %s214_s15 = scalar_lea.vmem (!%p205_p0), [#allocation2], %s534_s17 }
  0x33   : > { %689 = dma.done.wait (%p931_p6), %s211_s23, 256  }
  0x34   : > { %691 = vsyncadd (%p931_p6), %s211_s23, 4294967040  ;;  %vm249_vm0 = vcmask 1043456   ;;  %v241_v0 = vld [vmem:[%s214_s15] sm:$0xff]  ;;  %v242_v1 = vld [vmem:[%s214_s15 + $0x8] sm:$0xff]  ;;  %v713_v11 = vmov 0.0   ;;  %vm714_vm1 = vmmov 0   ;;  %v433_v33 = vlaneseq }
  0x35   : > { %v245_v2 = vcombine.high %v241_v0, %v241_v0  ;;  %v246_v3 = vcombine.high %v242_v1, %v242_v1  ;;  %v250_v4 = vsel %vm249_vm0, %v241_v0, 0.0  ;;  %v253_v6 = vsel %vm249_vm0, %v242_v1, 0.0  ;;  %551 = vmatprep.subr.mxu0 %v713_v11  ;;  %556 = vmatprep.subr.mxu1 %v713_v11  ;;  %v260_v14 = vld [vmem:[%s917_s1] sm:$0x3]  ;;  %s546_s7 = sshll.u32 %s769_s22, 8  ;;  %s240_s9 = scalar_lea.vmem [#allocation5], %s534_s17 }
  0x36   : > { %553 = vmatprep.mubr.msk.f32.mxu0 %vm714_vm1, %v713_v11  ;;  %558 = vmatprep.mubr.msk.f32.mxu1 %vm714_vm1, %v713_v11  ;;  %vm262_vm2 = vcmask 31744   ;;  %v261_v15 = vld [vmem:[%s918_s2] sm:$0x3]  ;;  %vm346_vm3 = vcmask 1041408   ;;  %vm342_vm4 = vcmask 15360   ;;  %v715_v21 = vmov 0   ;;  %s879_s15 = scalar_lea.hbm %s921_s5, %s546_s7 }
  0x37   : > { %v251_v5 = vsel %vm249_vm0, %v245_v2, 0.0  ;;  %v255_v8 = vsel %vm249_vm0, %v246_v3, 0.0  ;;  %v340_v20 = vld [vmem:[%s919_s3] sm:$0xf]  ;;  %611 = vset.pattern.permute.xlu0 %v715_v21  ;;  %v716_v31 = vmov 839922192  }
  0x38   : > { %v252_v7 = vadd.f32 %v251_v5, %v250_v4  ;;  %v341_v22 = vld [vmem:[%s920_s4] sm:$0xf]  ;;  %v431_v32 = vunpack.c.l.s4 %v716_v31  ;;  %v434_v35 = vshrl.u32 %v433_v33, 7  ;;  %s457_s10 = sshll.u32 %s240_s9, 4  ;;  %s443_s29 = scalar_lea.sflag [#allocation4], %s846_s13  ;;  %s458_s10 = int_to_ptr.vmem [resolvable:$true] %s457_s10 }
  0x39   : > { %s646_s12 = scalar_lea.vmem %s458_s10, 256  ;;  %p932_p12 = scmp.ne.s32.totalorder %s926_s30, 0 }
  0x3a   : > { %v254_v9 = vadd.f32 %v253_v6, %v252_v7  ;;  %v432_v34 = vunpack.c.0.s8 %v431_v32  ;;  %p647_p11 = scmp.ne.s32.totalorder %s458_s10, %s646_s12  ;;  %s717_s22 = smov [#allocation5]  }
  0x3b   : > { %s650_s17 = sshll.u32 %s717_s22, 4  ;;  %s651_s17 = int_to_ptr.vmem [resolvable:$false] %s650_s17 }
  0x3c   : > { %v256_v10 = vadd.f32 %v255_v8, %v254_v9  ;;  %v435_v36 = vsub.s32 %v432_v34, %v434_v35  ;;  %p648_p13 = pnand %p647_p11, %p932_p12  ;;  %s652_s14 = scalar_lea.vmem %s651_s17, 512 }
  0x3d   : > { %p653_p3 = scmp.lt.s32.totalorder %s458_s10, %s651_s17  ;;  %p654_p5 = scmp.lt.s32.totalorder %s652_s14, %s646_s12 }
  0x3e   : > { %257 = vadd.xlane.f32.xlu0 %v256_v10  ;;  %p649_p1 = pneg %p648_p13 }
  0x3f   : > { %p655_p8 = por %p654_p5, %p653_p3 }
  0x41   : > { %p656_p10 = pnand %p655_p8, %p649_p1 }
  0xc7   : > { %v258_v12 = vpop.xlane.xlu0 %257 }
  0xc8   : > { %v259_v13 = vmul.f32 0.001953125, %v258_v12 }
  0xca   : > { %552 = vmatpush3.msk.msra.mxu0 %vm249_vm0, %v259_v13 }
  0xcb   : > { %554 = vmatmul.mubr.msk.f32.vlgmr.msra.gmra.mxu0 %vm262_vm2, %v260_v14 }
 0x18b   : > { %v335_v16 = vpop.f32.mrf.mxu0 }
 0x18c   : > { %v336_v17 = vadd.f32 %v335_v16, %v261_v15 }
 0x18d   : > { %v555_v18 = vpop.f32.mrf.mxu0 }
 0x18e   : > { %v339_v19 = vmax.f32 %v336_v17, 0.0 }
 0x190   : > { %557 = vmatpush3.msk.msra.mxu1 %vm346_vm3, %v339_v19 }
 0x191   : > { %559 = vmatmul.mubr.msk.f32.vlgmr.msra.gmra.mxu1 %vm342_vm4, %v340_v20 }
 0x251   : > { %v416_v23 = vpop.f32.mrf.mxu1 }
 0x252   : > { %v417_v24 = vadd.f32 %v416_v23, %v341_v22 }
 0x253   : > { %v560_v25 = vpop.f32.mrf.mxu1 }
 0x254   : > { %v420_v26 = vsub.f32 0.0, %v417_v24 }
 0x256   : > { %v421_v27 = vmul.f32 1.442695, %v420_v26 }
 0x258   : > { %614 = vpow2.f32 %v421_v27 }
 0x265   : > { %v615_v28 = vpop.eup %614 }
 0x266   : > { %v423_v29 = vadd.f32 1.0, %v615_v28 }
 0x268   : > { %616 = vrcp.f32 %v423_v29 }
 0x275   : > { %v617_v30 = vpop.eup %616 }
 0x276   : > { %428 = vperm.xlu0 %611, %v617_v30  }
 0x2f1   : > { %v429_v37 = vpop.permute.xlu0 %428 }
 0x2f2   : > { %v436_v38 = vrot.slane %v429_v37, %v435_v36 }
 0x2f4   : > { %v438_v39 = vmul.f32 %v436_v38, %v241_v0  ;;  %v439_v40 = vmul.f32 %v436_v38, %v242_v1 }
 0x2f6   : > { %440 = vst [vmem:[%s240_s9] sm:$0xff] %v438_v39  ;;  %441 = vst [vmem:[%s240_s9 + $0x8] sm:$0xff] %v439_v40 }
 0x2f7   : > { %659 = shalt.err (!%p656_p10)
}
 0x2f8   : > { %s660_s16 = scalar_lea.hbm %s879_s15, 256  ;;  %s664_s26 = scalar_lea.hbm %s921_s5, 512 }
 0x2f9   : > { %p661_p2 = scmp.ne.s32.totalorder %s879_s15, %s660_s16  ;;  %p665_p7 = scmp.lt.s32.totalorder %s879_s15, %s921_s5 }
 0x2fa   : > { %p666_p0 = scmp.lt.s32.totalorder %s664_s26, %s660_s16 }
 0x2fb   : > { %p662_p4 = pnand %p661_p2, %p932_p12 }
 0x2fc   : > { %p667_p6 = por %p666_p0, %p665_p7 }
 0x2fd   : > { %p663_p9 = pneg %p662_p4 }
 0x2ff   : > { %p668_p11 = pnand %p667_p6, %p663_p9 }
 0x301   : > { %671 = shalt.err (!%p668_p11)
}
 0x302   : > { %563 = dma.vmem_to_hbm [thread:$0]  (%p932_p12), %s458_s10, 256, %s879_s15, %s443_s29  }
 0x303 PF: > { %s469_s7 = sand.u32 1, %s698_s18   ;;  %p933_p13 = scmp.ne.s32.totalorder %s927_s6, 0 }
 0x304   : > { %p934_p1 = scmp.ge.s32.totalorder %s710_s21, 2  ;;  %s470_s9 = scalar_lea.sflag [#allocation4], %s469_s7 }
 0x306   : > { %p570_p3 = pnand %p934_p1, %p933_p13 }
 0x308   : > { %p571_p5 = pneg %p570_p3 }
 0x30a   : > { %693 = dma.done.wait (%p571_p5), %s470_s9, 256  }
 0x30b   : > { %695 = vsyncadd (%p571_p5), %s470_s9, 4294967040  ;;  %p18_p8 = scmp.ge.s32.totalorder %s773_s24, 4   ;;  %s935_s18 = smov %s702_s19 }
 0x30c   : > { %s936_s19 = smov %s706_s20  ;;  %s937_s20 = smov %s785_s27 }
 0x30d   : > { %s938_s21 = smov %s773_s24  ;;  %20 = sbr.rel (!%p18_p8) target bundleno = 5 (0x5), region = 85 }
 0x312   :  { %475 = vsyncpa [#allocation3], 1 }
 0x313   :  { %477 = vsyncpa [#allocation3 + $0x1], 1 }
 0x314   :  { %478 = vsyncpa [#allocation4], 1 }
 0x315   :  { %480 = vsyncpa [#allocation4 + $0x1], 1 }

</bundles_post_ra>
